<compile_context>
chip_gen: v5e
topology: v5e:2x2
jax: 0.10.0
libtpu: 0.0.40
codegen_flags: <defaults>
</compile_context>

<pallas_src>
import functools
import math

import jax
import jax.numpy as jnp
from jax.experimental import pallas as pl
from jax.experimental.pallas import tpu as pltpu

DROPOUT_P = 0.1
KEEP_PROB = 1.0 - DROPOUT_P
_VMEM_TILE_BUDGET = 8 << 20          # bytes for the double-buffered row tiles


# ----------------------------------------------------------------- table ---

def positional_encoding_table(max_len, d_model, dtype=jnp.float32):
    """Same buffer as the PyTorch __init__ (sin on even cols, cos on odd)."""
    position = jnp.arange(max_len, dtype=jnp.float32)[:, None]           # (L, 1)
    div_term = jnp.exp(jnp.arange(0, d_model, 2, dtype=jnp.float32)
                       * (-math.log(10000.0) / d_model))                 # (D/2,)
    ang = position * div_term                                            # (L, D/2)
    pe = jnp.zeros((max_len, d_model), jnp.float32)
    pe = pe.at[:, 0::2].set(jnp.sin(ang))
    pe = pe.at[:, 1::2].set(jnp.cos(ang))
    return pe.astype(dtype)


# --------------------------------------------------------------- kernels ---

def _pe_dropout_kernel(x_ref, pe_ref, u_ref, o_ref):
    # x_ref: (1, TS, D)   pe_ref: (TS, D)   u_ref: (1, TS, D)   o_ref: (1, TS, D)
    y = x_ref[...].astype(jnp.float32) + pe_ref[...].astype(jnp.float32)
    keep = u_ref[...] < KEEP_PROB                       # P(keep) = 1 - p
    o_ref[...] = jnp.where(keep, y * (1.0 / KEEP_PROB), 0.0).astype(o_ref.dtype)


def _pe_add_kernel(x_ref, pe_ref, o_ref):
    # eval mode: nn.Dropout is the identity
    y = x_ref[...].astype(jnp.float32) + pe_ref[...].astype(jnp.float32)
    o_ref[...] = y.astype(o_ref.dtype)


# -------------------------------------------------------------- wrappers ---

def _pick_seq_tile(seq, d_model, itemsize):
    # 4 row-sized buffers (x, rand, out, pe) x 2 pipeline stages must fit the
    # VMEM budget; keep the tile sublane-aligned (multiple of 8) when possible.
    rows = max(8, _VMEM_TILE_BUDGET // (8 * d_model * itemsize))
    rows = min(seq, rows)
    if seq > 8:
        rows = max(8, (rows // 8) * 8)
    return int(rows)


def _tpu_params():
    # Mosaic-only params; skip them when the CPU/interpret fallback is active.
    if jax.default_backend() == "tpu":
        return pltpu.CompilerParams(
            dimension_semantics=("parallel", "parallel"))
    return None


@functools.partial(jax.jit, static_argnames=("training",))
def positional_encoding(x, pe_full, key, training=True):
    """x: (B, S, D).  Returns dropout(x + pe[:S]) (inverted dropout, p=0.1)."""
    bsz, seq, d_model = x.shape
    pe = pe_full[:seq].astype(x.dtype)                       # (S, D)

    ts = _pick_seq_tile(seq, d_model, x.dtype.itemsize)
    grid = (pl.cdiv(seq, ts), bsz)

    x_spec = pl.BlockSpec((1, ts, d_model), lambda s, b: (b, s, 0))
    pe_spec = pl.BlockSpec((ts, d_model), lambda s, b: (s, 0))   # resident over batch
    out_spec = pl.BlockSpec((1, ts, d_model), lambda s, b: (b, s, 0))

    nelem = bsz * seq * d_model
    if training:
        u = jax.random.uniform(key, x.shape, dtype=jnp.float32)
        cost = pl.CostEstimate(
            flops=3 * nelem,
            transcendentals=0,
            bytes_accessed=2 * nelem * x.dtype.itemsize       # x in, out
                           + nelem * 4                         # uniforms
                           + seq * d_model * x.dtype.itemsize) # pe
        return pl.pallas_call(
            _pe_dropout_kernel,
            out_shape=jax.ShapeDtypeStruct(x.shape, x.dtype),
            grid=grid,
            in_specs=[x_spec, pe_spec, x_spec],
            out_specs=out_spec,
            compiler_params=_tpu_params(),
            cost_estimate=cost,
        )(x, pe, u)

    cost = pl.CostEstimate(
        flops=nelem,
        transcendentals=0,
        bytes_accessed=2 * nelem * x.dtype.itemsize
                       + seq * d_model * x.dtype.itemsize)
    return pl.pallas_call(
        _pe_add_kernel,
        out_shape=jax.ShapeDtypeStruct(x.shape, x.dtype),
        grid=grid,
        in_specs=[x_spec, pe_spec],
        out_specs=out_spec,
        compiler_params=_tpu_params(),
        cost_estimate=cost,
    )(x, pe)


# ------------------------------------------------------------------ main ---

if __name__ == "__main__":
    B, S, D = 2, 8, 128          # D multiple of 128 -> lane-dense stores
    MAX_LEN = 60

    root = jax.random.PRNGKey(0)
    kx, kdrop = jax.random.split(root)

    x = jax.random.normal(kx, (B, S, D), dtype=jnp.float32)
    pe_full = positional_encoding_table(MAX_LEN, D)

    out_train = positional_encoding(x, pe_full, kdrop, training=True)
    jax.block_until_ready(out_train)

    out_eval = positional_encoding(x, pe_full, kdrop, training=False)
    jax.block_until_ready(out_eval)

    # sanity: eval path is exactly x + pe
    ref_eval = x + pe_full[:S][None, :, :]
    assert out_eval.shape == (B, S, D)
    assert jnp.allclose(out_eval, ref_eval, atol=1e-6), "eval path mismatch"

    # sanity: train path entries are either dropped (0) or (x + pe) / keep_prob
    ref_scaled = ref_eval * (1.0 / KEEP_PROB)
    ok = jnp.all((out_train == 0.0) | (jnp.abs(out_train - ref_scaled) < 1e-5))
    assert out_train.shape == (B, S, D)
    assert bool(ok), "train path mismatch"

    print("KERNEL_OK")
</pallas_src>

<mosaic_0001>
module attributes {stable_mosaic.version = 11 : i64} {
  func.func @_pe_dropout_kernel(%arg0: i32, %arg1: i32, %arg2: memref<1x8x128xf32, #tpu.memory_space<vmem>>, %arg3: memref<8x128xf32, #tpu.memory_space<vmem>>, %arg4: memref<1x8x128xf32, #tpu.memory_space<vmem>>, %arg5: memref<1x8x128xf32, #tpu.memory_space<vmem>>) attributes {dimension_semantics = [#tpu.dimension_semantics<arbitrary>, #tpu.dimension_semantics<arbitrary>], iteration_bounds = array<i64: 1, 2>, scalar_prefetch = 0 : i64, scratch_operands = 0 : i64, tpu.core_type = #tpu.core_type<tc>, window_params = [{transform_indices = @transform_0, window_bounds = array<i64: 1, 8, 128>}, {transform_indices = @transform_1, window_bounds = array<i64: 8, 128>}, {transform_indices = @transform_2, window_bounds = array<i64: 1, 8, 128>}, {transform_indices = @transform_3, window_bounds = array<i64: 1, 8, 128>}]} {
    %c0 = arith.constant 0 : index
    %c0_0 = arith.constant 0 : index
    %c0_1 = arith.constant 0 : index
    %0 = vector.load %arg2[%c0, %c0_0, %c0_1] : memref<1x8x128xf32, #tpu.memory_space<vmem>>, vector<1x8x128xf32>
    %c0_2 = arith.constant 0 : index
    %c0_3 = arith.constant 0 : index
    %1 = vector.load %arg3[%c0_2, %c0_3] : memref<8x128xf32, #tpu.memory_space<vmem>>, vector<8x128xf32>
    %2 = vector.shape_cast %1 : vector<8x128xf32> to vector<1x8x128xf32>
    %3 = arith.addf %0, %2 : vector<1x8x128xf32>
    %c0_4 = arith.constant 0 : index
    %c0_5 = arith.constant 0 : index
    %c0_6 = arith.constant 0 : index
    %4 = vector.load %arg4[%c0_4, %c0_5, %c0_6] : memref<1x8x128xf32, #tpu.memory_space<vmem>>, vector<1x8x128xf32>
    %cst = arith.constant 0.899999976 : f32
    %5 = vector.broadcast %cst : f32 to vector<1x8x128xf32>
    %6 = arith.cmpf olt, %4, %5 : vector<1x8x128xf32>
    %cst_7 = arith.constant 1.11111116 : f32
    %7 = vector.broadcast %cst_7 : f32 to vector<1x8x128xf32>
    %8 = arith.mulf %3, %7 : vector<1x8x128xf32>
    %cst_8 = arith.constant 0.000000e+00 : f32
    %9 = vector.broadcast %cst_8 : f32 to vector<1x8x128xf32>
    %10 = arith.select %6, %8, %9 : vector<1x8x128xi1>, vector<1x8x128xf32>
    %c0_9 = arith.constant 0 : index
    %c0_10 = arith.constant 0 : index
    %c0_11 = arith.constant 0 : index
    %11 = vector.load %arg5[%c0_9, %c0_10, %c0_11] : memref<1x8x128xf32, #tpu.memory_space<vmem>>, vector<1x8x128xf32>
    tpu.vector_store %arg5[%c0_9, %c0_10, %c0_11], %10 {strides = array<i32>} : memref<1x8x128xf32, #tpu.memory_space<vmem>>, vector<1x8x128xf32>,
    return
  }
  func.func @transform_0(%arg0: i32, %arg1: i32) -> (i32, i32, i32) {
    %c0_i32 = arith.constant 0 : i32
    %c0_i32_0 = arith.constant 0 : i32
    return %arg1, %arg0, %c0_i32 : i32, i32, i32
  }
  func.func @transform_1(%arg0: i32, %arg1: i32) -> (i32, i32) {
    %c0_i32 = arith.constant 0 : i32
    %c0_i32_0 = arith.constant 0 : i32
    return %arg0, %c0_i32 : i32, i32
  }
  func.func @transform_2(%arg0: i32, %arg1: i32) -> (i32, i32, i32) {
    %c0_i32 = arith.constant 0 : i32
    %c0_i32_0 = arith.constant 0 : i32
    return %arg1, %arg0, %c0_i32 : i32, i32, i32
  }
  func.func @transform_3(%arg0: i32, %arg1: i32) -> (i32, i32, i32) {
    %c0_i32 = arith.constant 0 : i32
    %c0_i32_0 = arith.constant 0 : i32
    return %arg1, %arg0, %c0_i32 : i32, i32, i32
  }
}

</mosaic_0001>

<bundles_post_ra>
// kernel: positional_encoding.1
= control target key start
LH: loop header
LB: loop body
LE: loop exit
PB: predicated region body
PF: predicated region fallthrough
CT: control target
= control target key end

     0   :  { %8 = vsyncpa [#allocation3], 0  ;;  %s633_s0 = inlined_call_operand.vmem [shape: f32[2,8,128], index: 0, kind: input, shape index: {}]   ;;  %s634_s1 = inlined_call_operand.vmem [shape: f32[8,128], index: 1, kind: input, shape index: {}]   ;;  %s635_s2 = inlined_call_operand.vmem [shape: f32[2,8,128], index: 2, kind: input, shape index: {}]   ;;  %s636_s3 = inlined_call_operand.hbm [shape: f32[2,8,128], index: 3, kind: output, shape index: {}]  }
   0x1   :  { %10 = vsyncpa [#allocation3 + $0x1], 0  ;;  %s530_s12 = smov 0   ;;  %s532_s13 = smov 0  }
   0x2   :  { %s534_s14 = smov 0   ;;  %s536_s15 = smov 0  }
   0x3   :  { %s538_s16 = smov 0   ;;  %s540_s17 = smov 0  }
   0x4 LB: > { %s362_s18 = sadd.s32 4294967295, %s508_s17   ;;  %s363_s19 = sadd.s32 4294967294, %s508_s17   ;;  %s508_s17 = sphi %s540_s17, %s16_s17   ;;  %s504_s16 = sphi %s538_s16, %s643_s16   ;;  %s500_s15 = sphi %s536_s15, %s642_s15   ;;  %s496_s14 = sphi %s534_s14, %s641_s14   ;;  %s492_s13 = sphi %s532_s13, %s640_s13   ;;  %s488_s12 = sphi %s530_s12, %s639_s12  }
   0x5   : > { %s25_s20 = sadd.s32 1, %s504_s16  ;;  %s119_s21 = sadd.s32 1, %s496_s14 }
   0x6   : > { %p26_p0 = scmp.ge.s32.totalorder %s25_s20, 2  ;;  %p129_p1 = scmp.ne.s32.totalorder %s496_s14, %s492_s13 }
   0x7   : > { %p130_p2 = scmp.eq.s32.totalorder %s362_s18, 1  ;;  %p135_p3 = scmp.ne.s32.totalorder %s492_s13, %s488_s12 }
   0x8   : > { %s645_s20 = smov (%p26_p0, %s25_s20), 0  ;;  %p136_p5 = scmp.eq.s32.totalorder %s363_s19, 1 }
   0x9   : > { %p570_p4 = por %p130_p2, %p129_p1  ;;  %s114_s23 = ssub.s32 %s504_s16, %s645_s20 }
   0xa   : > { %p367_p6 = scmp.ge.s32.totalorder %s508_s17, 1  ;;  %p117_p7 = scmp.eq.s32.totalorder %s114_s23, 0 }
   0xb   : > { %p577_p8 = por %p136_p5, %p135_p3  ;;  %p181_p9 = scmp.lt.s32.totalorder %s508_s17, 3 }
   0xc   : > { %s583_s25 = scalar_select %p117_p7, %s496_s14, %s119_s21  }
   0xd   : > { %p182_p10 = pnand %p367_p6, %p181_p9 }
   0xe   : > { %s215_s26 = sand.u32 (!%p182_p10), 1, %s492_s13   ;;  %p218_p11 = scmp.lt.s32.totalorder (!%p182_p10), %s500_s15, 1 }
   0xf   : > { %185 = sbr.rel (%p182_p10) target bundleno = 33 (0x21), region = 32  ;;  %s368_s27 = sshll.u32 (!%p182_p10), %s215_s26, 3 }
  0x10   : > { %s372_s28 = sshll.u32 (!%p182_p10), %s500_s15, 3 }
  0x11   : > { %s256_s7 = scalar_lea.hbm (!%p182_p10), %s636_s3, %s372_s28  ;;  %s245_s28 = scalar_lea.sflag (!%p182_p10), [#allocation3], %s215_s26 }
  0x12   : > { %s260_s23 = sshll.u32 (!%p182_p10), %s256_s7, 4  ;;  %s261_s23 = int_to_ptr.hbm [resolvable:$true] %s260_s23 }
  0x13   : > { %s444_s30 = sshra.s32 (!%p182_p10), %s261_s23, 4  ;;  %s445_s30 = int_to_ptr.hbm [resolvable:$true] %s444_s30 }
  0x14   : > { %s647_s15 = smov (!%p218_p11, %s500_s15), 1  ;;  %v237_v0 = vld [vmem:[%s634_s1] sm:$0xff]  ;;  %s446_s4 = scalar_lea.hbm %s445_s30, 8 }
  0x15   : > { %s369_s29 = sshll.u32 %s647_s15, 3  ;;  %s217_s15 = scalar_lea.vmem [#allocation2], %s368_s27 }
  0x16   : > { %s224_s10 = scalar_lea.vmem %s633_s0, %s369_s29  ;;  %s235_s19 = scalar_lea.vmem %s635_s2, %s369_s29 }
  0x17   : > { %v236_v1 = vld [vmem:[%s224_s10] sm:$0xff]  ;;  %s258_s21 = sshll.u32 %s217_s15, 4  ;;  %p447_p12 = scmp.ne.s32.totalorder %s445_s30, %s446_s4  ;;  %s259_s21 = int_to_ptr.vmem [resolvable:$true] %s258_s21 }
  0x18   : > { %v239_v2 = vld [vmem:[%s235_s19] sm:$0xff]  ;;  %v238_v3 = vadd.f32 %v237_v0, %v236_v1  ;;  %s450_s27 = scalar_lea.hbm %s636_s3, 16  ;;  %p451_p1 = scmp.lt.s32.totalorder %s445_s30, %s636_s3 }
  0x19   : > { %vm240_vm0 = vcmp.lt.f32.partialorder %v239_v2, 0.9  ;;  %p448_p13 = pnand %p447_p12, %p570_p4  ;;  %p452_p2 = scmp.lt.s32.totalorder %s450_s27, %s446_s4 }
  0x1a   : > { %v241_v4 = vmul.f32 1.1111112, %v238_v3 }
  0x1b   : > { %p449_p0 = pneg %p448_p13  ;;  %p453_p3 = por %p452_p2, %p451_p1 }
  0x1c   : > { %v242_v5 = vsel %vm240_vm0, %v241_v4, 0.0 }
  0x1d   : > { %243 = vst [vmem:[%s217_s15] sm:$0xff] %v242_v5  ;;  %p454_p5 = pnand %p453_p3, %p449_p0 }
  0x1f   : > { %457 = shalt.err (!%p454_p5)
}
  0x20   : > { %375 = dma.vmem_to_hbm [thread:$0]  (%p570_p4), %s259_s21, 128, %s261_s23, %s245_s28  }
  0x21 PF: > { %p381_p6 = scmp.ge.s32.totalorder %s508_s17, 2  ;;  %s272_s26 = sand.u32 1, %s488_s12  }
  0x22   : > { %s273_s8 = scalar_lea.sflag [#allocation3], %s272_s26 }
  0x23   : > { %p378_p7 = pnand %p381_p6, %p577_p8 }
  0x25   : > { %p379_p9 = pneg %p378_p7 }
  0x27   : > { %483 = dma.done.wait (%p379_p9), %s273_s8, 128  }
  0x28   : > { %485 = vsyncadd (%p379_p9), %s273_s8, 4294967168  ;;  %s16_s17 = sadd.s32 1, %s508_s17   ;;  %s639_s12 = smov %s492_s13 }
  0x29   : > { %p13_p10 = scmp.ge.s32.totalorder %s16_s17, 4   ;;  %s640_s13 = smov %s496_s14 }
  0x2a   : > { %s641_s14 = smov %s583_s25  ;;  %s642_s15 = smov %s504_s16 }
  0x2b   : > { %s643_s16 = smov %s645_s20  ;;  %15 = sbr.rel (!%p13_p10) target bundleno = 4 (0x4), region = 73 }
  0x30   :  { %279 = vsyncpa [#allocation3], 1 }
  0x31   :  { %281 = vsyncpa [#allocation3 + $0x1], 1 }

</bundles_post_ra>
